<compile_context>
chip_gen: v5e
topology: v5e:2x2
jax: 0.10.0
libtpu: 0.0.40
codegen_flags: <defaults>
</compile_context>

<pallas_src>
import functools

import jax
import jax.numpy as jnp
from jax.experimental import pallas as pl
from jax.experimental.pallas import tpu as pltpu


def _concat_dma_kernel(*refs, lane_sizes, rows_per_shard):
    """refs = (*in_hbm_refs, out_hbm_ref, dma_sems).

    Each input i is a (B, L_i) HBM array; the output is (B, sum(L_i)).  The
    current grid step ("shard") DMA-copies its batch-row range of every input
    directly into the corresponding lane window of the output.
    """
    n_in = len(lane_sizes)
    in_refs = refs[:n_in]
    out_ref = refs[n_in]
    sem = refs[n_in + 1]

    shard = pl.program_id(0)
    row0 = pl.multiple_of(shard * rows_per_shard, rows_per_shard)

    copies = []
    off = 0
    for i, (src, ls) in enumerate(zip(in_refs, lane_sizes)):
        cp = pltpu.make_async_copy(
            src.at[pl.ds(row0, rows_per_shard), :],
            out_ref.at[pl.ds(row0, rows_per_shard), off:off + ls],
            sem.at[i],
        )
        cp.start()          # all per-input DMAs run concurrently
        copies.append(cp)
        off += ls
    for cp in copies:
        cp.wait()


def concat_channels(xs):
    """Equivalent of torch.cat(xs, dim=1) for a list of NCHW arrays."""
    assert len(xs) >= 1
    B, _, H, W = xs[0].shape
    dtype = xs[0].dtype
    for x in xs:
        assert x.shape[0] == B and x.shape[2] == H and x.shape[3] == W
        assert x.dtype == dtype

    channels = tuple(int(x.shape[1]) for x in xs)
    c_total = sum(channels)

    # Flatten to (B, C_i*H*W): contiguous view, channel offsets become lane
    # offsets in the flattened output row.
    lane_sizes = tuple(c * H * W for c in channels)
    l_total = c_total * H * W
    itemsize = jnp.dtype(dtype).itemsize
    flat_xs = [x.reshape(B, ls) for x, ls in zip(xs, lane_sizes)]

    # >=2 parallel shards when possible so v7x's two TensorCores both issue
    # DMAs; a single shard otherwise.
    # TODO(synk): odd B > 1 currently runs as one shard (static pl.ds sizes);
    # an uneven two-way split would need a padded/short-last-shard schedule.
    num_shards = 2 if (B >= 2 and B % 2 == 0) else 1
    rows_per_shard = B // num_shards

    bytes_accessed = 2 * B * l_total * itemsize  # read everything + write once

    out_flat = pl.pallas_call(
        functools.partial(
            _concat_dma_kernel,
            lane_sizes=lane_sizes,
            rows_per_shard=rows_per_shard,
        ),
        out_shape=jax.ShapeDtypeStruct((B, l_total), dtype),
        grid=(num_shards,),
        in_specs=[pl.BlockSpec(memory_space=pl.ANY) for _ in xs],
        out_specs=pl.BlockSpec(memory_space=pl.ANY),
        scratch_shapes=[pltpu.SemaphoreType.DMA((len(xs),))],
        compiler_params=pltpu.CompilerParams(
            dimension_semantics=("parallel",),
        ),
        cost_estimate=pl.CostEstimate(
            flops=0, transcendentals=0, bytes_accessed=bytes_accessed),
    )(*flat_xs)

    return out_flat.reshape(B, c_total, H, W)


if __name__ == "__main__":
    key = jax.random.PRNGKey(0)
    k1, k2, k3 = jax.random.split(key, 3)

    # Small NCHW inputs with differing channel counts (typical YOLO-style concat).
    x1 = jax.random.normal(k1, (2, 4, 16, 16), dtype=jnp.float32)
    x2 = jax.random.normal(k2, (2, 6, 16, 16), dtype=jnp.float32)
    x3 = jax.random.normal(k3, (2, 2, 16, 16), dtype=jnp.float32)

    out = concat_channels([x1, x2, x3])
    out = jax.block_until_ready(out)

    ref = jnp.concatenate([x1, x2, x3], axis=1)
    assert out.shape == ref.shape, (out.shape, ref.shape)
    assert jnp.array_equal(out, ref), "mismatch vs jnp.concatenate reference"

    print("KERNEL_OK")
</pallas_src>

<mosaic_0001>
module attributes {stable_mosaic.version = 11 : i64} {
  func.func @_concat_dma_kernel(%arg0: i32, %arg1: memref<2x1024xf32, #tpu.memory_space<any>>, %arg2: memref<2x1536xf32, #tpu.memory_space<any>>, %arg3: memref<2x512xf32, #tpu.memory_space<any>>, %arg4: memref<2x3072xf32, #tpu.memory_space<any>>, %arg5: memref<3x!tpu.dma_semaphore, #tpu.memory_space<semaphore_mem>>) attributes {dimension_semantics = [#tpu.dimension_semantics<parallel>], iteration_bounds = array<i64: 2>, scalar_prefetch = 0 : i64, scratch_operands = 1 : i64, tpu.core_type = #tpu.core_type<tc>, window_params = [{}, {}, {}, {}]} {
    %c1_i32 = arith.constant 1 : i32
    %0 = arith.muli %arg0, %c1_i32 : i32
    %1 = tpu.assume_multiple %0, 1 : i32
    %c0_i32 = arith.constant 0 : i32
    %c0_i32_0 = arith.constant 0 : i32
    %2 = tpu.memref_slice %arg1[%1, %c0_i32_0] : memref<2x1024xf32, #tpu.memory_space<any>> -> memref<1x1024xf32, #tpu.memory_space<any>>
    %c0_i32_1 = arith.constant 0 : i32
    %3 = tpu.memref_slice %arg4[%1, %c0_i32_1] : memref<2x3072xf32, #tpu.memory_space<any>> -> memref<1x1024xf32, #tpu.memory_space<any>>
    %4 = tpu.memref_slice %arg5[%c0_i32] : memref<3x!tpu.dma_semaphore, #tpu.memory_space<semaphore_mem>> -> memref<1x!tpu.dma_semaphore, #tpu.memory_space<semaphore_mem>>
    %5 = tpu.memref_squeeze %4 : memref<1x!tpu.dma_semaphore, #tpu.memory_space<semaphore_mem>> -> memref<!tpu.dma_semaphore, #tpu.memory_space<semaphore_mem>>
    tpu.enqueue_dma source(%2 : memref<1x1024xf32, #tpu.memory_space<any>>) target(%3 : memref<1x1024xf32, #tpu.memory_space<any>>) target_semaphore(%5 : memref<!tpu.dma_semaphore, #tpu.memory_space<semaphore_mem>>)
    %c1_i32_2 = arith.constant 1 : i32
    %c0_i32_3 = arith.constant 0 : i32
    %6 = tpu.memref_slice %arg2[%1, %c0_i32_3] : memref<2x1536xf32, #tpu.memory_space<any>> -> memref<1x1536xf32, #tpu.memory_space<any>>
    %c1024_i32 = arith.constant 1024 : i32
    %7 = tpu.memref_slice %arg4[%1, %c1024_i32] : memref<2x3072xf32, #tpu.memory_space<any>> -> memref<1x1536xf32, #tpu.memory_space<any>>
    %8 = tpu.memref_slice %arg5[%c1_i32_2] : memref<3x!tpu.dma_semaphore, #tpu.memory_space<semaphore_mem>> -> memref<1x!tpu.dma_semaphore, #tpu.memory_space<semaphore_mem>>
    %9 = tpu.memref_squeeze %8 : memref<1x!tpu.dma_semaphore, #tpu.memory_space<semaphore_mem>> -> memref<!tpu.dma_semaphore, #tpu.memory_space<semaphore_mem>>
    tpu.enqueue_dma source(%6 : memref<1x1536xf32, #tpu.memory_space<any>>) target(%7 : memref<1x1536xf32, #tpu.memory_space<any>>) target_semaphore(%9 : memref<!tpu.dma_semaphore, #tpu.memory_space<semaphore_mem>>)
    %c2_i32 = arith.constant 2 : i32
    %c0_i32_4 = arith.constant 0 : i32
    %10 = tpu.memref_slice %arg3[%1, %c0_i32_4] : memref<2x512xf32, #tpu.memory_space<any>> -> memref<1x512xf32, #tpu.memory_space<any>>
    %c2560_i32 = arith.constant 2560 : i32
    %11 = tpu.memref_slice %arg4[%1, %c2560_i32] : memref<2x3072xf32, #tpu.memory_space<any>> -> memref<1x512xf32, #tpu.memory_space<any>>
    %12 = tpu.memref_slice %arg5[%c2_i32] : memref<3x!tpu.dma_semaphore, #tpu.memory_space<semaphore_mem>> -> memref<1x!tpu.dma_semaphore, #tpu.memory_space<semaphore_mem>>
    %13 = tpu.memref_squeeze %12 : memref<1x!tpu.dma_semaphore, #tpu.memory_space<semaphore_mem>> -> memref<!tpu.dma_semaphore, #tpu.memory_space<semaphore_mem>>
    tpu.enqueue_dma source(%10 : memref<1x512xf32, #tpu.memory_space<any>>) target(%11 : memref<1x512xf32, #tpu.memory_space<any>>) target_semaphore(%13 : memref<!tpu.dma_semaphore, #tpu.memory_space<semaphore_mem>>)
    %c0_i32_5 = arith.constant 0 : i32
    %c0_i32_6 = arith.constant 0 : i32
    %14 = tpu.memref_slice %arg1[%1, %c0_i32_6] : memref<2x1024xf32, #tpu.memory_space<any>> -> memref<1x1024xf32, #tpu.memory_space<any>>
    %c0_i32_7 = arith.constant 0 : i32
    %15 = tpu.memref_slice %arg4[%1, %c0_i32_7] : memref<2x3072xf32, #tpu.memory_space<any>> -> memref<1x1024xf32, #tpu.memory_space<any>>
    %16 = tpu.memref_slice %arg5[%c0_i32_5] : memref<3x!tpu.dma_semaphore, #tpu.memory_space<semaphore_mem>> -> memref<1x!tpu.dma_semaphore, #tpu.memory_space<semaphore_mem>>
    %17 = tpu.memref_squeeze %16 : memref<1x!tpu.dma_semaphore, #tpu.memory_space<semaphore_mem>> -> memref<!tpu.dma_semaphore, #tpu.memory_space<semaphore_mem>>
    tpu.wait_dma2 semaphore(%17 : memref<!tpu.dma_semaphore, #tpu.memory_space<semaphore_mem>>) src(%14 : memref<1x1024xf32, #tpu.memory_space<any>>) dst(%15 : memref<1x1024xf32, #tpu.memory_space<any>>)
    %c1_i32_8 = arith.constant 1 : i32
    %c0_i32_9 = arith.constant 0 : i32
    %18 = tpu.memref_slice %arg2[%1, %c0_i32_9] : memref<2x1536xf32, #tpu.memory_space<any>> -> memref<1x1536xf32, #tpu.memory_space<any>>
    %c1024_i32_10 = arith.constant 1024 : i32
    %19 = tpu.memref_slice %arg4[%1, %c1024_i32_10] : memref<2x3072xf32, #tpu.memory_space<any>> -> memref<1x1536xf32, #tpu.memory_space<any>>
    %20 = tpu.memref_slice %arg5[%c1_i32_8] : memref<3x!tpu.dma_semaphore, #tpu.memory_space<semaphore_mem>> -> memref<1x!tpu.dma_semaphore, #tpu.memory_space<semaphore_mem>>
    %21 = tpu.memref_squeeze %20 : memref<1x!tpu.dma_semaphore, #tpu.memory_space<semaphore_mem>> -> memref<!tpu.dma_semaphore, #tpu.memory_space<semaphore_mem>>
    tpu.wait_dma2 semaphore(%21 : memref<!tpu.dma_semaphore, #tpu.memory_space<semaphore_mem>>) src(%18 : memref<1x1536xf32, #tpu.memory_space<any>>) dst(%19 : memref<1x1536xf32, #tpu.memory_space<any>>)
    %c2_i32_11 = arith.constant 2 : i32
    %c0_i32_12 = arith.constant 0 : i32
    %22 = tpu.memref_slice %arg3[%1, %c0_i32_12] : memref<2x512xf32, #tpu.memory_space<any>> -> memref<1x512xf32, #tpu.memory_space<any>>
    %c2560_i32_13 = arith.constant 2560 : i32
    %23 = tpu.memref_slice %arg4[%1, %c2560_i32_13] : memref<2x3072xf32, #tpu.memory_space<any>> -> memref<1x512xf32, #tpu.memory_space<any>>
    %24 = tpu.memref_slice %arg5[%c2_i32_11] : memref<3x!tpu.dma_semaphore, #tpu.memory_space<semaphore_mem>> -> memref<1x!tpu.dma_semaphore, #tpu.memory_space<semaphore_mem>>
    %25 = tpu.memref_squeeze %24 : memref<1x!tpu.dma_semaphore, #tpu.memory_space<semaphore_mem>> -> memref<!tpu.dma_semaphore, #tpu.memory_space<semaphore_mem>>
    tpu.wait_dma2 semaphore(%25 : memref<!tpu.dma_semaphore, #tpu.memory_space<semaphore_mem>>) src(%22 : memref<1x512xf32, #tpu.memory_space<any>>) dst(%23 : memref<1x512xf32, #tpu.memory_space<any>>)
    return
  }
}

</mosaic_0001>

<bundles_post_ra>
// kernel: tpu_custom_call.1
= control target key start
LH: loop header
LB: loop body
LE: loop exit
PB: predicated region body
PF: predicated region fallthrough
CT: control target
= control target key end

     0   :  { %s208_s12 = smov 0   ;;  %s250_s0 = inlined_call_operand.hbm [shape: f32[2,1024], index: 0, kind: input, shape index: {}]   ;;  %s251_s1 = inlined_call_operand.hbm [shape: f32[2,1536], index: 1, kind: input, shape index: {}]   ;;  %s252_s2 = inlined_call_operand.hbm [shape: f32[2,512], index: 2, kind: input, shape index: {}]   ;;  %s253_s3 = inlined_call_operand.hbm [shape: f32[2,3072], index: 3, kind: output, shape index: {}]  }
   0x1 LB: > { %s214_s13 = sshrl.u32 %s177_s12, 1  ;;  %s217_s14 = sand.u32 1, %s177_s12   ;;  %s177_s12 = sphi %s208_s12, %s13_s12  }
   0x2   : > { %s143_s15 = sshll.u32 %s214_s13, 4  ;;  %s20_s16 = smul.u32 48, %s214_s13 }
   0x3   : > { %s18_s17 = sadd.s32 %s143_s15, %s217_s14  ;;  %s179_s27 = smov 32  }
   0x4   : > { %s19_s20 = scalar_lea.hbm %s250_s0, %s18_s17  ;;  %s21_s21 = sadd.s32 %s20_s16, %s217_s14 }
   0x5   : > { %s229_s24 = scalar_lea.hbm %s253_s3, %s21_s21  ;;  %s27_s25 = sshll.u32 %s19_s20, 4  ;;  %s28_s25 = int_to_ptr.hbm [resolvable:$true] %s27_s25 }
   0x6   : > { %s29_s26 = sshll.u32 %s229_s24, 4  ;;  %34 = sst [smem:[#allocation4]] %s179_s27  ;;  %s30_s26 = int_to_ptr.hbm [resolvable:$true] %s29_s26 }
   0x7   : > { %36 = sst [smem:[#allocation4 + $0x1]] %s179_s27  ;;  %s180_s28 = smov 1  }
   0x8   : > { %38 = sst [smem:[#allocation4 + $0x2]] %s180_s28  ;;  %s181_s29 = smov [#allocation2]  }
   0x9   : > { %s182_s30 = smov [#allocation3]   ;;  %s183_s4 = smov 0  }
   0xa   : > { %40 = dma.general %s28_s25, 128, %s30_s26, %s181_s29, %s182_s30, [#allocation4], %s183_s4, 0  }
   0xb   : > { %58 = sst [smem:[#allocation6]] %s179_s27  ;;  %s41_s5 = smul.u32 24, %s214_s13 }
   0xc   : > { %60 = sst [smem:[#allocation6 + $0x1]] %s179_s27  ;;  %s130_s6 = scalar_lea.hbm %s229_s24, 16 }
   0xd   : > { %62 = sst [smem:[#allocation6 + $0x2]] %s180_s28  ;;  %s42_s7 = sadd.s32 %s41_s5, %s217_s14 }
   0xe   : > { %s43_s10 = scalar_lea.hbm %s251_s1, %s42_s7  ;;  %s53_s11 = sshll.u32 %s130_s6, 4  ;;  %s54_s11 = int_to_ptr.hbm [resolvable:$true] %s53_s11 }
   0xf   : > { %s51_s15 = sshll.u32 %s43_s10, 4  ;;  %s144_s16 = sshll.u32 %s214_s13, 3  ;;  %s52_s15 = int_to_ptr.hbm [resolvable:$true] %s51_s15 }
  0x10   : > { %s184_s17 = smov [#allocation2 + $0x1]   ;;  %s185_s18 = smov [#allocation5]  }
  0x11   : > { %64 = dma.general %s52_s15, 192, %s54_s11, %s184_s17, %s185_s18, [#allocation6], %s183_s4, 0  }
  0x12   : > { %82 = sst [smem:[#allocation8]] %s179_s27  ;;  %s66_s19 = sadd.s32 %s144_s16, %s217_s14 }
  0x13   : > { %84 = sst [smem:[#allocation8 + $0x1]] %s179_s27  ;;  %s67_s22 = scalar_lea.hbm %s252_s2, %s66_s19 }
  0x14   : > { %86 = sst [smem:[#allocation8 + $0x2]] %s180_s28  ;;  %s137_s23 = scalar_lea.hbm %s229_s24, 40 }
  0x15   : > { %s75_s25 = sshll.u32 %s67_s22, 4  ;;  %s77_s26 = sshll.u32 %s137_s23, 4  ;;  %s76_s25 = int_to_ptr.hbm [resolvable:$true] %s75_s25  ;;  %s78_s26 = int_to_ptr.hbm [resolvable:$true] %s77_s26 }
  0x16   : > { %s186_s29 = smov [#allocation2 + $0x2]   ;;  %s187_s30 = smov [#allocation7]  }
  0x17   : > { %88 = dma.general %s76_s25, 64, %s78_s26, %s186_s29, %s187_s30, [#allocation8], %s183_s4, 0  }
  0x18   : > { %169 = dma.done.wait [#allocation2], 128 }
  0x19   : > { %170 = vsyncadd [#allocation2], 4294967168 }
  0x1a   : > { %171 = dma.done.wait [#allocation2 + $0x1], 192 }
  0x1b   : > { %172 = vsyncadd [#allocation2 + $0x1], 4294967104 }
  0x1c   : > { %173 = dma.done.wait [#allocation2 + $0x2], 64 }
  0x1d   : > { %174 = vsyncadd [#allocation2 + $0x2], 4294967232  ;;  %s13_s12 = sadd.s32 1, %s177_s12  }
  0x1e   : > { %p10_p0 = scmp.ge.s32.totalorder %s13_s12, 2  }
  0x20   :  { %12 = sbr.rel (!%p10_p0) target bundleno = 1 (0x1), region = 35 }
  0x25   :  { %98 = vsyncmov [#allocation2] }
  0x28   :  { %s99_s13 = vpop.sfrf %98 }
  0x29   :  { %p145_p1 = scmp.ne.s32.totalorder %s99_s13, 0 }
  0x2b   :  { %103 = shalt.err (%p145_p1)  }
  0x2c   :  { %105 = vsyncmov [#allocation2 + $0x1] }
  0x2f   :  { %s106_s14 = vpop.sfrf %105 }
  0x30   :  { %p146_p2 = scmp.ne.s32.totalorder %s106_s14, 0 }
  0x32   :  { %110 = shalt.err (%p146_p2)  }
  0x33   :  { %112 = vsyncmov [#allocation2 + $0x2] }
  0x36   :  { %s113_s24 = vpop.sfrf %112 }
  0x37   :  { %p147_p3 = scmp.ne.s32.totalorder %s113_s24, 0 }
  0x39   :  { %117 = shalt.err (%p147_p3)  }

</bundles_post_ra>
